<compile_context>
chip_gen: v7x
topology: tpu7x:2x2x1
jax: 0.10.0
libtpu: 0.0.40
codegen_flags: <defaults>
</compile_context>

<pallas_src>
import functools
import math

import jax
import jax.numpy as jnp
from jax import lax
from jax.experimental import pallas as pl
from jax.experimental.pallas import tpu as pltpu


def make_pos_embedding(emb_size: int, maxlen: int) -> jnp.ndarray:
    """Deterministic buffer, identical math to the PyTorch __init__."""
    den = jnp.exp(
        -jnp.arange(0, emb_size, 2, dtype=jnp.float32) * math.log(10000.0) / emb_size
    )
    pos = jnp.arange(0, maxlen, dtype=jnp.float32).reshape(maxlen, 1)
    pe = jnp.zeros((maxlen, emb_size), dtype=jnp.float32)
    pe = pe.at[:, 0::2].set(jnp.sin(pos * den))
    pe = pe.at[:, 1::2].set(jnp.cos(pos * den))
    return pe[:, None, :]  # (maxlen, 1, emb_size)


def _pos_enc_kernel(seed_ref, x_ref, pe_ref, o_ref, *, p: float, batch: int,
                    cols: int, tile_s: int):
    # x_ref/o_ref: (TS, B*E) VMEM; pe_ref: (TS, E) VMEM.
    pe = pe_ref[...]
    if batch > 1:
        # Replicate the (TS, E) pe tile across the batch along the lane axis:
        # x2d[s, b*E + e] needs pe[s, e].  Lane concat is cheap VMEM work and
        # only touches 1/B of the x bytes per copy.
        pe = jnp.concatenate([pe] * batch, axis=1)  # (TS, B*E)
    y = x_ref[...] + pe

    if p > 0.0:
        # Inverted dropout with a stateless counter-hash: mask = f(seed,
        # global element index), so it is identical regardless of tiling or
        # megacore sharding.
        # TODO(synk): torch.nn.Dropout's exact RNG stream is not reproducible
        # here; a counter-hash (or pltpu.prng_random_bits on-device) is used.
        shape = y.shape
        r = lax.broadcasted_iota(jnp.int32, shape, 0)
        c = lax.broadcasted_iota(jnp.int32, shape, 1)
        # int32 wraps for >2^31 elements; that only perturbs the hash input
        # (mod 2^32) and is statistically harmless.
        base = pl.program_id(0) * (tile_s * cols)            # scalar tile offset
        glin = (r * cols + c + base).astype(jnp.uint32)      # global element idx
        seed_mix = seed_ref[0].astype(jnp.uint32) * jnp.uint32(0x9E3779B9)
        h = glin ^ seed_mix
        h = h * jnp.uint32(0x7FEB352D)
        h = h ^ (h >> jnp.uint32(16))
        h = h * jnp.uint32(0x846CA68B)
        # Full 32-bit threshold (p quantized to 1/2^32); keep-scale folded in.
        thresh = jnp.uint32(min(int(round(p * (1 << 32))), 0xFFFFFFFF))
        keep = h >= thresh
        y = y * jnp.where(keep, jnp.float32(1.0 / (1.0 - p)), jnp.float32(0.0))

    o_ref[...] = y.astype(o_ref.dtype)


def _choose_seq_tile(S: int, row_bytes: int, target_bytes: int = 3 << 20) -> int:
    """Pick the seq tile (second-to-last block dim).

    * ~3 MiB x blocks: double-buffered x + out + pe stays well under v5e's
      scoped-VMEM default and v7x's 64 MiB physical VMEM, while large enough
      to amortize the ~0.35 us per-grid-step overhead.
    * Multiple of 8 (sublane aligned) and near-evenly dividing S (no tiny
      remainder tile).
    * At least 2 tiles for non-tiny inputs so v7x's two TensorCores both get
      work via dimension_semantics=("parallel",).
    """
    if S < 16 or S * row_bytes <= (2 << 20):
        return S  # tiny input: single block, no pipelining / megacore benefit
    rows = max(8, min(S, target_bytes // max(1, row_bytes)))
    n_tiles = max(2, (S + rows - 1) // rows)
    ts = (S + n_tiles - 1) // n_tiles          # balanced split
    ts = ((ts + 7) // 8) * 8                   # sublane aligned
    return min(ts, S)


def positional_encoding(token_embedding, pos_embedding, *, dropout_p=0.0, seed=0):
    """token_embedding: (S, B, E); pos_embedding: (maxlen, 1, E)."""
    S, B, E = token_embedding.shape
    maxlen = pos_embedding.shape[0]
    assert S <= maxlen, "sequence longer than maxlen"
    BE = B * E

    # Free, contiguous reshapes: lane-dense (last dim B*E), sublane-dense
    # (second-to-last dim = seq tile).
    x2 = token_embedding.reshape(S, BE)
    pe2 = pos_embedding.reshape(maxlen, E)

    TS = _choose_seq_tile(S, BE * token_embedding.dtype.itemsize)
    if TS % 8 != 0:
        # Single-tile path with TS == S not a multiple of 8: make the pe block
        # equal to its full array dims (tiny S*E copy, satisfies (8,128) rule).
        pe2 = pe2[:S]
    grid = (pl.cdiv(S, TS),)

    seed_arr = jnp.asarray([seed], dtype=jnp.int32)
    kernel = functools.partial(_pos_enc_kernel, p=float(dropout_p), batch=B,
                               cols=BE, tile_s=TS)

    out2 = pl.pallas_call(
        kernel,
        out_shape=jax.ShapeDtypeStruct((S, BE), token_embedding.dtype),
        grid_spec=pltpu.PrefetchScalarGridSpec(
            num_scalar_prefetch=1,           # seed lands in SMEM
            grid=grid,
            in_specs=[
                pl.BlockSpec((TS, BE), lambda i, seed: (i, 0)),
                # pos_embedding stays whole in HBM; index_map picks the rows
                # needed by this seq tile.
                pl.BlockSpec((TS, E), lambda i, seed: (i, 0)),
            ],
            out_specs=pl.BlockSpec((TS, BE), lambda i, seed: (i, 0)),
        ),
        compiler_params=pltpu.CompilerParams(
            # Independent seq tiles: shard across TensorCores on v7x.
            dimension_semantics=("parallel",),
            # 32 MiB is safe on all generations and lifts v5e's 16 MiB default.
            vmem_limit_bytes=32 << 20,
        ),
    )(seed_arr, x2, pe2)
    return out2.reshape(S, B, E)


if __name__ == "__main__":
    SEQ, BATCH, EMB, MAXLEN = 8, 2, 32, 64

    key = jax.random.PRNGKey(0)
    x = jax.random.normal(key, (SEQ, BATCH, EMB), dtype=jnp.float32)
    pe = make_pos_embedding(EMB, MAXLEN)

    ref = x + pe[:SEQ]

    # Eval mode (p=0): must match the pure-JAX reference exactly.
    out_eval = jax.block_until_ready(positional_encoding(x, pe, dropout_p=0.0))
    assert out_eval.shape == (SEQ, BATCH, EMB)
    assert jnp.allclose(out_eval, ref, atol=1e-6), "eval-mode mismatch"

    # Train mode (p=0.1): inverted dropout computed in-kernel.
    p = 0.1
    out_train = jax.block_until_ready(
        positional_encoding(x, pe, dropout_p=p, seed=123)
    )
    assert out_train.shape == (SEQ, BATCH, EMB)
    # Every element must be either dropped (0) or (x+pe)/(1-p).
    scaled = ref / (1.0 - p)
    ok = (jnp.isclose(out_train, 0.0, atol=1e-6)
          | jnp.isclose(out_train, scaled, atol=1e-5, rtol=1e-5))
    assert bool(jnp.all(ok)), "train-mode dropout values inconsistent"

    print("KERNEL_OK")
</pallas_src>

<mosaic_0001>
module attributes {stable_mosaic.version = 11 : i64} {
  func.func @_pos_enc_kernel(%arg0: i32, %arg1: memref<1xi32, #tpu.memory_space<smem>>, %arg2: memref<8x64xf32, #tpu.memory_space<vmem>>, %arg3: memref<8x32xf32, #tpu.memory_space<vmem>>, %arg4: memref<8x64xf32, #tpu.memory_space<vmem>>) attributes {dimension_semantics = [#tpu.dimension_semantics<parallel>], iteration_bounds = array<i64: 1>, scalar_prefetch = 1 : i64, scratch_operands = 0 : i64, tpu.core_type = #tpu.core_type<tc>, window_params = [{transform_indices = @transform_0, window_bounds = array<i64: 8, 64>}, {transform_indices = @transform_1, window_bounds = array<i64: 8, 32>}, {transform_indices = @transform_2, window_bounds = array<i64: 8, 64>}]} {
    %c0 = arith.constant 0 : index
    %c0_0 = arith.constant 0 : index
    %0 = vector.load %arg3[%c0, %c0_0] : memref<8x32xf32, #tpu.memory_space<vmem>>, vector<8x32xf32>
    %1 = tpu.concatenate %0, %0 in 1 : vector<8x32xf32>, vector<8x32xf32> -> vector<8x64xf32>
    %c0_1 = arith.constant 0 : index
    %c0_2 = arith.constant 0 : index
    %2 = vector.load %arg2[%c0_1, %c0_2] : memref<8x64xf32, #tpu.memory_space<vmem>>, vector<8x64xf32>
    %3 = arith.addf %2, %1 : vector<8x64xf32>
    %c0_3 = arith.constant 0 : index
    %c0_4 = arith.constant 0 : index
    %4 = vector.load %arg4[%c0_3, %c0_4] : memref<8x64xf32, #tpu.memory_space<vmem>>, vector<8x64xf32>
    tpu.vector_store %arg4[%c0_3, %c0_4], %3 {strides = array<i32>} : memref<8x64xf32, #tpu.memory_space<vmem>>, vector<8x64xf32>,
    return
  }
  func.func @transform_0(%arg0: i32, %arg1: memref<1xi32, #tpu.memory_space<smem>>) -> (i32, i32) {
    %c0_i32 = arith.constant 0 : i32
    %c0_i32_0 = arith.constant 0 : i32
    return %arg0, %c0_i32 : i32, i32
  }
  func.func @transform_1(%arg0: i32, %arg1: memref<1xi32, #tpu.memory_space<smem>>) -> (i32, i32) {
    %c0_i32 = arith.constant 0 : i32
    %c0_i32_0 = arith.constant 0 : i32
    return %arg0, %c0_i32 : i32, i32
  }
  func.func @transform_2(%arg0: i32, %arg1: memref<1xi32, #tpu.memory_space<smem>>) -> (i32, i32) {
    %c0_i32 = arith.constant 0 : i32
    %c0_i32_0 = arith.constant 0 : i32
    return %arg0, %c0_i32 : i32, i32
  }
}

</mosaic_0001>

<bundles_post_ra>
// kernel: tpu_custom_call.1
= control target key start
LH: loop header
LB: loop body
LE: loop exit
PB: predicated region body
PF: predicated region fallthrough
CT: control target
= control target key end

     0   :  { %s105_s0 = inlined_call_operand.<no memory space> [shape: s32[1], index: 0, kind: input, shape index: {}]   ;;  %s106_s1 = inlined_call_operand.vmem [shape: f32[8,64], index: 1, kind: input, shape index: {}]   ;;  %s107_s2 = inlined_call_operand.vmem [shape: f32[64,32], index: 2, kind: input, shape index: {}]   ;;  %s108_s3 = inlined_call_operand.hbm [shape: f32[8,64], index: 3, kind: output, shape index: {}]  }
   0x1   :  { %v14_v0 = vld [vmem:[%s107_s2] sm:$0xff] }
   0x2   :  { %9 = vsyncpa [#allocation5], 0  ;;  %s65_s14 = smov 32   ;;  %vm19_vm0 = vcmask 261120   ;;  %v21_v1 = vld [vmem:[%s106_s1] sm:$0xff]  ;;  %s66_s0 = smov [#allocation4]  }
   0x3   :  { %16 = vrot.lane.b32.xlu0 %v14_v0, %s65_s14  ;;  %s31_s17 = sshll.u32 %s66_s0, 4  ;;  %vm23_vm1 = vcmask 523264   ;;  %s32_s17 = int_to_ptr.vmem [resolvable:$true] %s31_s17 }
   0x4   :  { %s41_s18 = scalar_lea.vmem %s32_s17, 128  ;;  %p46_p1 = scmp.lt.s32.totalorder %s32_s17, %s32_s17 }
   0x5   :  { %p42_p0 = scmp.ne.s32.totalorder %s32_s17, %s41_s18  ;;  %p47_p2 = scmp.lt.s32.totalorder %s41_s18, %s41_s18 }
   0x7   :  { %p48_p3 = por %p47_p2, %p46_p1 }
   0x9   :  { %p49_p4 = pnand %p48_p3, %p42_p0 }
  0x75   :  { %v17_v2 = vpop.permute.xlu0 %16 }
  0x76   :  { %v20_v3 = vsel %vm19_vm0, %v14_v0, %v17_v2 }
  0x77   :  { %v22_v4 = vadd.f32 %v21_v1, %v20_v3 }
  0x79   :  { %24 = vst.msk [vmem:[#allocation4] sm:$0xff] %vm23_vm1, %v22_v4 }
  0x7a   :  { %52 = shalt.err (!%p49_p4)
}
  0x7b   :  { %s53_s20 = scalar_lea.hbm %s108_s3, 128 }
  0x7c   :  { %p54_p5 = scmp.ne.s32.totalorder %s108_s3, %s53_s20  ;;  %p57_p6 = scmp.lt.u32.totalorder %s53_s20, %s108_s3 }
  0x7e   :  { %p59_p7 = pnand %p57_p6, %p54_p5 }
  0x80   :  { %62 = shalt.err (!%p59_p7)
}
  0x81   :  { %34 = dma.vmem_to_hbm [thread:$0]  %s32_s17, 128, %s108_s3, [#allocation5]  }
  0x82   :  { %63 = dma.done.wait [#allocation5], 128  }
  0x83   :  { %64 = vsyncadd [#allocation5], 4294967168 }
  0x84   :  { %38 = vsyncpa [#allocation5], 1 }

</bundles_post_ra>
